<compile_context>
chip_gen: v6e
topology: v6e:2x2x1
jax: 0.10.0
libtpu: 0.0.40
codegen_flags: <defaults>
</compile_context>

<pallas_src>
import jax
import jax.numpy as jnp
from jax.experimental import pallas as pl
from jax.experimental.pallas import tpu as pltpu


# ---------------------------------------------------------------------------
# Kernels
# ---------------------------------------------------------------------------
def _decoder_kernel_single_k(x_ref, wt_ref, o_ref):
    """Full-latent contraction in one MXU pass per (i, j) tile."""
    o_ref[...] = jnp.dot(
        x_ref[...], wt_ref[...], preferred_element_type=jnp.float32
    ).astype(o_ref.dtype)


def _decoder_kernel_k_f32out(x_ref, wt_ref, o_ref):
    """K-tiled path, f32 output: accumulate directly into the resident o_ref."""
    k = pl.program_id(2)
    partial = jnp.dot(x_ref[...], wt_ref[...], preferred_element_type=jnp.float32)

    @pl.when(k == 0)
    def _():
        o_ref[...] = partial

    @pl.when(k > 0)
    def _():
        o_ref[...] += partial


def _decoder_kernel_k_acc(x_ref, wt_ref, o_ref, acc_ref):
    """K-tiled path, narrow output dtype: f32 VMEM accumulator scratch."""
    k = pl.program_id(2)

    @pl.when(k == 0)
    def _():
        acc_ref[...] = jnp.zeros_like(acc_ref)

    acc_ref[...] += jnp.dot(
        x_ref[...], wt_ref[...], preferred_element_type=jnp.float32
    )

    @pl.when(k == pl.num_programs(2) - 1)
    def _():
        o_ref[...] = acc_ref[...].astype(o_ref.dtype)


# ---------------------------------------------------------------------------
# Helpers
# ---------------------------------------------------------------------------
def _round_up(x, m):
    return ((x + m - 1) // m) * m


def _sublane_align(dtype):
    """Sublane packing of one vreg: 8 rows f32, 16 bf16, 32 int8/fp8."""
    return {1: 32, 2: 16, 4: 8}.get(jnp.dtype(dtype).itemsize, 8)


def _vmem_capacity_bytes():
    try:
        return int(pltpu.get_tpu_info().vmem_capacity_bytes)
    except Exception:
        # v7x has 64 MiB per TensorCore; safe lower bound across generations.
        return 64 * 1024 * 1024


# ---------------------------------------------------------------------------
# Wrapper
# ---------------------------------------------------------------------------
def decoder_forward(x, wt, *, tm=None, tn=None, tk=None):
    """Bias-free linear layer: out = x @ wt  (wt is the pre-transposed weight).

    Args:
      x:  [batch, latent_size] activations (f32 or bf16).
      wt: [latent_size, input_size] weight, i.e. torch Linear weight transposed
          ONCE at init time (equivalent to x @ W.T with W [input_size, latent]).
      tm, tn, tk: optional tile overrides (None = auto).
    Returns:
      [batch, input_size] output in x.dtype.
    """
    assert x.ndim == 2 and wt.ndim == 2
    batch, latent = x.shape
    latent_w, input_size = wt.shape
    assert latent == latent_w, "latent dims of x and wt must match"

    out_dtype = x.dtype
    xb = jnp.dtype(x.dtype).itemsize
    wb = jnp.dtype(wt.dtype).itemsize
    ob = jnp.dtype(out_dtype).itemsize

    sub = _sublane_align(x.dtype)
    vmem_cap = _vmem_capacity_bytes()
    usable = vmem_cap - (8 << 20)  # headroom for compiler-internal scratch

    # TODO(synk): for genuinely tiny / lane-unaligned outputs (input_size < 128,
    # as in the module's raw data width) a plain jnp.dot beats any Pallas kernel
    # (vst.msk partial stores + fixed pallas_call overhead dominate); callers
    # should pad input_size to a multiple of 128 or bypass this kernel.

    # ---- M tile (sublane axis of x / out blocks) ----
    if tm is None:
        tm = batch if batch <= 512 else 512  # 512 is a multiple of 8/16/32
    # ---- N tile (lane axis of wt / out blocks; 256-aligned for v6e/v7x MXU) ----
    if tn is None:
        tn = input_size if input_size <= 1024 else 1024

    # ---- Megacore guard: give both v7x TensorCores work on the parallel grid ----
    gm, gn = pl.cdiv(batch, tm), pl.cdiv(input_size, tn)
    if gm * gn == 1:
        if input_size >= 256:
            tn = _round_up(pl.cdiv(input_size, 2), 128)
        elif batch >= 2 * sub:
            tm = _round_up(pl.cdiv(batch, 2), sub)

    def working_set(tk_, with_acc):
        ws = 2 * (tm * tk_ * xb + tk_ * tn * wb) + 2 * tm * tn * ob
        if with_acc:
            ws += tm * tn * 4
        return ws

    # ---- K tile: prefer the full latent dim (no K axis at all) ----
    if tk is None:
        if working_set(latent, with_acc=False) <= usable - (4 << 20):
            tk = latent
        else:
            fixed = 2 * tm * tn * ob + tm * tn * 4
            per_k = 2 * (tm * xb + tn * wb)
            budget = usable - (4 << 20) - fixed
            tk_max = max(256, (budget // per_k // 256) * 256)
            tk_max = min(tk_max, _round_up(latent, 256))
            # Prefer an aligned divisor of latent (avoids zero-padding copies).
            tk = None
            for align in (256, 128):
                t = (tk_max // align) * align
                while t >= align:
                    if latent % t == 0:
                        tk = t
                        break
                    t -= align
                if tk is not None:
                    break
            if tk is None:
                tk = tk_max  # latent will be zero-padded below
    else:
        tk = min(tk, latent)
        assert tk == latent or tk % 128 == 0, "explicit tk must be 128-aligned"

    use_k_axis = tk < latent
    if use_k_axis and latent % tk != 0:
        # Zero-pad the contraction dim so partial K blocks contribute 0.
        pad = _round_up(latent, tk) - latent
        x = jnp.pad(x, ((0, 0), (0, pad)))
        wt = jnp.pad(wt, ((0, pad), (0, 0)))
        latent += pad

    gm, gn = pl.cdiv(batch, tm), pl.cdiv(input_size, tn)

    flops = 2 * batch * latent * input_size
    bytes_accessed = (gn * batch * latent * xb      # x re-read per N block
                      + gm * latent * input_size * wb  # wt re-read per M block
                      + batch * input_size * ob)
    cost = pl.CostEstimate(flops=flops, transcendentals=0,
                           bytes_accessed=bytes_accessed)

    if not use_k_axis:
        kernel = _decoder_kernel_single_k
        grid = (gm, gn)
        in_specs = [
            pl.BlockSpec((tm, latent), lambda i, j: (i, 0)),   # x
            pl.BlockSpec((latent, tn), lambda i, j: (0, j)),   # wt
        ]
        out_specs = pl.BlockSpec((tm, tn), lambda i, j: (i, j))
        scratch = []
        dims = ("parallel", "parallel")
        tile_bytes = working_set(latent, with_acc=False)
    else:
        grid = (gm, gn, latent // tk)  # K last (reduction, output-resident)
        in_specs = [
            pl.BlockSpec((tm, tk), lambda i, j, k: (i, k)),    # x
            pl.BlockSpec((tk, tn), lambda i, j, k: (k, j)),    # wt
        ]
        out_specs = pl.BlockSpec((tm, tn), lambda i, j, k: (i, j))
        dims = ("parallel", "parallel", "arbitrary")
        if jnp.dtype(out_dtype) == jnp.dtype(jnp.float32):
            kernel = _decoder_kernel_k_f32out      # accumulate into o_ref
            scratch = []
            tile_bytes = working_set(tk, with_acc=False)
        else:
            kernel = _decoder_kernel_k_acc         # f32 scratch accumulator
            scratch = [pltpu.VMEM((tm, tn), jnp.float32)]
            tile_bytes = working_set(tk, with_acc=True)

    vmem_limit = int(min(usable, max(32 << 20, tile_bytes + (4 << 20))))

    return pl.pallas_call(
        kernel,
        out_shape=jax.ShapeDtypeStruct((batch, input_size), out_dtype),
        grid=grid,
        in_specs=in_specs,
        out_specs=out_specs,
        scratch_shapes=scratch,
        compiler_params=pltpu.CompilerParams(
            dimension_semantics=dims,
            vmem_limit_bytes=vmem_limit,
        ),
        cost_estimate=cost,
    )(x, wt)


# ---------------------------------------------------------------------------
# Checks
# ---------------------------------------------------------------------------
if __name__ == "__main__":
    key = jax.random.PRNGKey(0)
    k_x, k_w, k_x2, k_w2, k_x3, k_w3 = jax.random.split(key, 6)

    # ---- Module-scale shapes: latent_size = latent_shape**2 = 16, small batch.
    # input_size is taken as 128 so output stores are lane-dense; single-K path.
    batch, latent_size, input_size = 8, 4 ** 2, 128

    # torch nn.Linear weight layout: [out_features, in_features] = [input, latent]
    w = (jax.random.normal(k_w, (input_size, latent_size), jnp.float32)
         * (1.0 / jnp.sqrt(latent_size)))
    wt = jnp.asarray(w.T)  # one-time layout change at init time (NOT per call)
    x = jax.random.normal(k_x, (batch, latent_size), jnp.float32)

    out = jax.block_until_ready(decoder_forward(x, wt))
    ref = x @ w.T
    assert out.shape == (batch, input_size)
    assert jnp.allclose(out, ref, atol=1e-5, rtol=1e-5)

    # ---- Larger bf16 check: single-K path, multi-block parallel (megacore) grid
    B2, K2, N2 = 512, 1024, 2048
    x2 = jax.random.normal(k_x2, (B2, K2), jnp.float32).astype(jnp.bfloat16)
    wt2 = (jax.random.normal(k_w2, (K2, N2), jnp.float32)
           * (1.0 / jnp.sqrt(K2))).astype(jnp.bfloat16)
    out2 = jax.block_until_ready(decoder_forward(x2, wt2))
    ref2 = jnp.dot(x2.astype(jnp.float32), wt2.astype(jnp.float32))
    assert out2.shape == (B2, N2)
    assert jnp.allclose(out2.astype(jnp.float32), ref2, atol=5e-2, rtol=5e-2)

    # ---- Forced K-tiled paths (explicit tk): f32 acc-into-output ...
    B3, K3, N3 = 256, 4096, 512
    x3 = jax.random.normal(k_x3, (B3, K3), jnp.float32)
    wt3 = jax.random.normal(k_w3, (K3, N3), jnp.float32) * (1.0 / jnp.sqrt(K3))
    out3 = jax.block_until_ready(decoder_forward(x3, wt3, tk=1024))
    ref3 = x3 @ wt3
    assert jnp.allclose(out3, ref3, atol=1e-3, rtol=1e-3)

    # ... and bf16 with f32 scratch accumulator.
    x3b, wt3b = x3.astype(jnp.bfloat16), wt3.astype(jnp.bfloat16)
    out3b = jax.block_until_ready(decoder_forward(x3b, wt3b, tk=1024))
    ref3b = jnp.dot(x3b.astype(jnp.float32), wt3b.astype(jnp.float32))
    assert jnp.allclose(out3b.astype(jnp.float32), ref3b, atol=5e-2, rtol=5e-2)

    print("KERNEL_OK")
</pallas_src>

<mosaic_0001>
module attributes {stable_mosaic.version = 11 : i64} {
  func.func @_decoder_kernel_single_k(%arg0: i32, %arg1: i32, %arg2: memref<8x16xf32, #tpu.memory_space<vmem>>, %arg3: memref<16x128xf32, #tpu.memory_space<vmem>>, %arg4: memref<8x128xf32, #tpu.memory_space<vmem>>) attributes {dimension_semantics = [#tpu.dimension_semantics<parallel>, #tpu.dimension_semantics<parallel>], iteration_bounds = array<i64: 1, 1>, scalar_prefetch = 0 : i64, scratch_operands = 0 : i64, tpu.core_type = #tpu.core_type<tc>, window_params = [{transform_indices = @transform_0, window_bounds = array<i64: 8, 16>}, {transform_indices = @transform_1, window_bounds = array<i64: 16, 128>}, {transform_indices = @transform_2, window_bounds = array<i64: 8, 128>}]} {
    %c0 = arith.constant 0 : index
    %c0_0 = arith.constant 0 : index
    %0 = vector.load %arg2[%c0, %c0_0] : memref<8x16xf32, #tpu.memory_space<vmem>>, vector<8x16xf32>
    %c0_1 = arith.constant 0 : index
    %c0_2 = arith.constant 0 : index
    %1 = vector.load %arg3[%c0_1, %c0_2] : memref<16x128xf32, #tpu.memory_space<vmem>>, vector<16x128xf32>
    %cst = arith.constant dense<0.000000e+00> : vector<8x128xf32>
    %2 = tpu.matmul %0, %1, %cst {dimension_numbers = #tpu.dot_dimension_numbers<[1], [0], [0], [1], [0, 0, 1, 1], [], []>} : vector<8x16xf32>, vector<16x128xf32>, vector<8x128xf32> -> vector<8x128xf32>
    %c0_3 = arith.constant 0 : index
    %c0_4 = arith.constant 0 : index
    %3 = vector.load %arg4[%c0_3, %c0_4] : memref<8x128xf32, #tpu.memory_space<vmem>>, vector<8x128xf32>
    tpu.vector_store %arg4[%c0_3, %c0_4], %2 {strides = array<i32>} : memref<8x128xf32, #tpu.memory_space<vmem>>, vector<8x128xf32>,
    return
  }
  func.func @transform_0(%arg0: i32, %arg1: i32) -> (i32, i32) {
    %c0_i32 = arith.constant 0 : i32
    %c0_i32_0 = arith.constant 0 : i32
    return %arg0, %c0_i32 : i32, i32
  }
  func.func @transform_1(%arg0: i32, %arg1: i32) -> (i32, i32) {
    %c0_i32 = arith.constant 0 : i32
    %c0_i32_0 = arith.constant 0 : i32
    return %c0_i32, %arg1 : i32, i32
  }
  func.func @transform_2(%arg0: i32, %arg1: i32) -> (i32, i32) {
    %c0_i32 = arith.constant 0 : i32
    return %arg0, %arg1 : i32, i32
  }
}

</mosaic_0001>

<bundles_post_ra>
// kernel: tpu_custom_call.1
= control target key start
LH: loop header
LB: loop body
LE: loop exit
PB: predicated region body
PF: predicated region fallthrough
CT: control target
= control target key end

     0   :  { %7 = vsyncpa [#allocation3], 0  ;;  %s247_s0 = inlined_call_operand.hbm [shape: f32[8,16], index: 0, kind: input, shape index: {}]   ;;  %s248_s1 = inlined_call_operand.hbm [shape: f32[16,128], index: 1, kind: input, shape index: {}]   ;;  %s249_s2 = inlined_call_operand.hbm [shape: f32[8,128], index: 2, kind: output, shape index: {}]  }
   0x1   :  { %8 = vsyncpa [#allocation6], 0 }
   0x2   :  { %9 = vsyncpa [#allocation4], 0  ;;  %s216_s9 = smov [#allocation2]   ;;  %s217_s11 = smov [#allocation5]  }
   0x3   :  { %s16_s10 = sshll.u32 %s216_s9, 4  ;;  %s25_s12 = sshll.u32 %s217_s11, 4  ;;  %s17_s10 = int_to_ptr.vmem [resolvable:$true] %s16_s10  ;;  %s26_s12 = int_to_ptr.vmem [resolvable:$true] %s25_s12 }
   0x4   :  { %s158_s13 = scalar_lea.vmem %s17_s10, 128  ;;  %p163_p1 = scmp.lt.s32.totalorder %s17_s10, %s17_s10 }
   0x5   :  { %p159_p0 = scmp.ne.s32.totalorder %s17_s10, %s158_s13  ;;  %p164_p2 = scmp.lt.s32.totalorder %s158_s13, %s158_s13 }
   0x7   :  { %p165_p3 = por %p164_p2, %p163_p1 }
   0x9   :  { %p166_p4 = pnand %p165_p3, %p159_p0 }
   0xb   :  { %169 = shalt.err (!%p166_p4)
}
   0xc   :  { %19 = dma.hbm_to_vmem [thread:$0]  %s247_s0, 128, %s17_s10, [#allocation3]  }
   0xd   :  { %s178_s16 = scalar_lea.vmem %s26_s12, 256  ;;  %p183_p6 = scmp.lt.s32.totalorder %s26_s12, %s26_s12 }
   0xe   :  { %p179_p5 = scmp.ne.s32.totalorder %s26_s12, %s178_s16  ;;  %p184_p7 = scmp.lt.s32.totalorder %s178_s16, %s178_s16 }
  0x10   :  { %p185_p8 = por %p184_p7, %p183_p6 }
  0x12   :  { %p186_p9 = pnand %p185_p8, %p179_p5 }
  0x14   :  { %189 = shalt.err (!%p186_p9)
}
  0x15   :  { %s218_s17 = smov 128   ;;  %s219_s18 = smov 8  }
  0x16   :  { %31 = dma.hbm_to_vmem [thread:$0]  %s248_s1, 256, %s26_s12, [#allocation6], %s218_s17, %s218_s17, %s219_s18  }
  0x17   :  { %210 = dma.done.wait [#allocation3], 128  }
  0x18   :  { %211 = vsyncadd [#allocation3], 4294967168 }
  0x19   :  { %212 = dma.done.wait [#allocation6], 256  }
  0x1a   :  { %213 = vsyncadd [#allocation6], 4294967040  ;;  %v220_v0 = vmov 0.0   ;;  %vm221_vm0 = vmmov 0   ;;  %v40_v1 = vld [vmem:[#allocation5 + $0x8] sm:$0xff]  ;;  %v39_v2 = vld [vmem:[#allocation5] sm:$0xff] }
  0x1b   :  { %136 = vmatprep.subr.mxu0 %v220_v0  ;;  %140 = vmatprep.mubr.msk.f32.mxu0 %vm221_vm0, %v220_v0  ;;  %v38_v3 = vld [vmem:[#allocation2] sm:$0xff]  ;;  %vm41_vm1 = vcmask 130048   ;;  %s222_s0 = smov [#allocation7]  }
  0x1c   :  { %137 = vmatpush3.msra.mxu0 %v40_v1  ;;  %s122_s21 = sshll.u32 %s222_s0, 4  ;;  %s123_s21 = int_to_ptr.vmem [resolvable:$true] %s122_s21 }
  0x1d   :  { %138 = vmatprep.subr.mxu0 %v220_v0  ;;  %s190_s1 = scalar_lea.vmem %s123_s21, 128  ;;  %p195_p11 = scmp.lt.s32.totalorder %s123_s21, %s123_s21 }
  0x1e   :  { %139 = vmatpush3.msra.mxu0 %v39_v2  ;;  %p191_p10 = scmp.ne.s32.totalorder %s123_s21, %s190_s1  ;;  %p196_p12 = scmp.lt.s32.totalorder %s190_s1, %s190_s1 }
  0x1f   :  { %141 = vmatmul.mubr.msk.f32.vlgmr.msra.gmra.mxu0 %vm41_vm1, %v38_v3 }
  0x20   :  { %p197_p13 = por %p196_p12, %p195_p11 }
  0x22   :  { %p198_p0 = pnand %p197_p13, %p191_p10 }
  0xdf   :  { %v111_v4 = vpop.f32.mrf.mxu0 }
  0xe0   :  { %115 = vst [vmem:[#allocation7] sm:$0xff] %v111_v4 }
  0xe1   :  { %v142_v5 = vpop.f32.mrf.mxu0 }
  0xe2   :  { %201 = shalt.err (!%p198_p0)
}
  0xe3   :  { %125 = dma.vmem_to_hbm [thread:$0]  %s123_s21, 128, %s249_s2, [#allocation4]  }
  0xe4   :  { %214 = dma.done.wait [#allocation4], 128  }
  0xe5   :  { %215 = vsyncadd [#allocation4], 4294967168 }
  0xe6   :  { %129 = vsyncpa [#allocation3], 1 }
  0xe7   :  { %130 = vsyncpa [#allocation6], 1 }
  0xe8   :  { %131 = vsyncpa [#allocation4], 1 }

</bundles_post_ra>
